<compile_context>
chip_gen: v6e
topology: v6e:2x2x1
jax: 0.10.0
libtpu: 0.0.40
codegen_flags: <defaults>
</compile_context>

<pallas_src>
import jax
import jax.numpy as jnp
import numpy as np
from jax.experimental import pallas as pl
from jax.experimental.pallas import tpu as pltpu


# --------------------------------------------------------------------------------------
# Pass 1: conv (single im2col matmul on the MXU) + fused per-channel batch statistics.
# --------------------------------------------------------------------------------------
def _conv_stats_kernel(p_ref, w_ref, conv_ref, sum_ref, ssq_ref):
    """p_ref: (tile_m, 9*Cin) im2col rows, w_ref: (9*Cin, Cout).

    Writes the conv tile and accumulates per-channel sum / sum-of-squares across the
    (sequential) row-tile grid axis.
    """
    conv = jnp.dot(p_ref[...], w_ref[...], preferred_element_type=jnp.float32)
    conv_ref[...] = conv

    @pl.when(pl.program_id(0) == 0)
    def _():
        sum_ref[...] = jnp.zeros_like(sum_ref)
        ssq_ref[...] = jnp.zeros_like(ssq_ref)

    sum_ref[...] += jnp.sum(conv, axis=0, keepdims=True)
    ssq_ref[...] += jnp.sum(conv * conv, axis=0, keepdims=True)


# --------------------------------------------------------------------------------------
# Pass 2a: folded BN (one FMA) + ReLU + MaxPool2d(2).
# --------------------------------------------------------------------------------------
def _bn_relu_maxpool_kernel(conv_ref, scale_ref, shift_ref, out_ref, yh_ref):
    """conv_ref: (Ht, W, Cout) tile, scale/shift: (1, Cout), out_ref: (Ht//2, W//2, Cout)."""
    y = jnp.maximum(conv_ref[...] * scale_ref[...] + shift_ref[...], 0.0)   # (Ht, W, C)
    ht, w, c = y.shape
    # Pool along H first: splitting/reducing an *outer* dim leaves the (W, C) minor
    # layout untouched (no sublane relayout).
    yh_ref[...] = jnp.max(y.reshape(ht // 2, 2, w, c), axis=1)              # (Ht//2, W, C)
    # Pool along W with strided sublane reads from VMEM (no reshape of the W dim).
    wo = w // 2
    out_ref[...] = jnp.maximum(yh_ref[:, pl.ds(0, wo, stride=2), :],
                               yh_ref[:, pl.ds(1, wo, stride=2), :])


# --------------------------------------------------------------------------------------
# Pass 2b: folded BN + ReLU + AdaptiveMaxPool2d((1,1)) (global spatial max).
# --------------------------------------------------------------------------------------
def _bn_relu_gmaxpool_kernel(conv_ref, scale_ref, shift_ref, out_ref):
    """conv_ref: (H, W, Cout) for one batch element, out_ref: (1, 1, Cout)."""
    y = jnp.maximum(conv_ref[...] * scale_ref[...] + shift_ref[...], 0.0)   # (H, W, C)
    m = jnp.max(y, axis=1, keepdims=True)                                   # (H, 1, C)
    out_ref[...] = jnp.max(m, axis=0, keepdims=True)                        # (1, 1, C)


def _pick_row_tile(m, cap=256):
    """Largest divisor of m that is <= cap and sublane-aligned (or the full dim)."""
    for t in range(min(m, cap), 0, -1):
        if m % t == 0 and (t % 8 == 0 or t == m):
            return t
    return m


def _pick_h_tile(h, cap=8):
    """Largest even divisor of h that is <= cap."""
    for t in range(min(h, cap), 0, -1):
        if h % t == 0 and t % 2 == 0:
            return t
    return h


def basic_block_forward(x_nchw, conv_w, conv_b, gamma, beta, *, block_idx, eps=1e-5):
    """NCHW in -> NCHW out.  Matches training-mode BatchNorm (batch statistics)."""
    assert block_idx <= 3
    N, Cin, H, W = x_nchw.shape
    Cout = conv_w.shape[0]
    if block_idx < 3:
        # MaxPool2d(2) path assumes even spatial dims (PyTorch would floor odd sizes).
        assert H % 2 == 0 and W % 2 == 0, "MaxPool2d(2) path requires even H and W"

    f32 = jnp.float32
    vmem_limit = 32 * 1024 * 1024   # safe on v5e/v6e/v7x (v7x physical VMEM is 64 MiB)

    # TODO(synk): accept NHWC input and build the 3x3 halo inside pass 1 (index_map
    # overlap + edge masking) to remove these wrapper-side HBM passes (matters most
    # on v5e, which is memory-bound here).
    x = jnp.transpose(x_nchw, (0, 2, 3, 1)).astype(f32)              # NHWC
    xpad = jnp.pad(x, ((0, 0), (1, 1), (1, 1), (0, 0)))              # pad=1 spatially

    # im2col built once (tap-major, channel-minor): columns ordered (dy, dx, cin).
    M, K = N * H * W, 9 * Cin
    patches = [xpad[:, dy:dy + H, dx:dx + W, :] for dy in range(3) for dx in range(3)]
    p = jnp.concatenate(patches, axis=-1).reshape(M, K)
    # PyTorch weight (Cout, Cin, 3, 3) -> (ky, kx, Cin, Cout) -> (9*Cin, Cout),
    # matching the im2col column order above.
    w = jnp.transpose(conv_w, (2, 3, 1, 0)).reshape(K, Cout).astype(f32)
    # Conv bias is intentionally dropped: training-mode BatchNorm subtracts the batch
    # mean, which cancels a per-channel bias exactly (verified against the reference).
    del conv_b

    # ---------------- pass 1: conv (one MXU matmul per row tile) + batch stats --------
    tile_m = _pick_row_tile(M)
    conv_flat, csum, cssq = pl.pallas_call(
        _conv_stats_kernel,
        out_shape=(jax.ShapeDtypeStruct((M, Cout), f32),
                   jax.ShapeDtypeStruct((1, Cout), f32),
                   jax.ShapeDtypeStruct((1, Cout), f32)),
        grid=(M // tile_m,),
        in_specs=[pl.BlockSpec((tile_m, K), lambda i: (i, 0)),
                  pl.BlockSpec((K, Cout), lambda i: (0, 0))],
        out_specs=[pl.BlockSpec((tile_m, Cout), lambda i: (i, 0)),
                   pl.BlockSpec((1, Cout), lambda i: (0, 0)),
                   pl.BlockSpec((1, Cout), lambda i: (0, 0))],
        compiler_params=pltpu.CompilerParams(
            dimension_semantics=("arbitrary",),       # stats accumulate across tiles
            vmem_limit_bytes=vmem_limit),
        cost_estimate=pl.CostEstimate(
            flops=2 * M * K * Cout,
            transcendentals=0,
            bytes_accessed=4 * (M * K + K * Cout + M * Cout + 2 * Cout)),
    )(p, w)

    # ---------------- fold BN into one per-channel FMA (tiny per-channel math) --------
    cnt = jnp.float32(M)
    mean = csum / cnt
    var = jnp.maximum(cssq / cnt - mean * mean, 0.0)   # biased variance, like torch BN
    scale = gamma.reshape(1, Cout).astype(f32) * jax.lax.rsqrt(var + eps)
    shift = beta.reshape(1, Cout).astype(f32) - mean * scale

    conv_nhwc = conv_flat.reshape(N, H, W, Cout)       # row-major: free reshape

    # ---------------- pass 2: normalize + ReLU + pool ---------------------------------
    if block_idx == 3:
        out_nhwc = pl.pallas_call(
            _bn_relu_gmaxpool_kernel,
            out_shape=jax.ShapeDtypeStruct((N, 1, 1, Cout), f32),
            grid=(N,),
            in_specs=[pl.BlockSpec((None, H, W, Cout), lambda n: (n, 0, 0, 0)),
                      pl.BlockSpec((1, Cout), lambda n: (0, 0)),
                      pl.BlockSpec((1, Cout), lambda n: (0, 0))],
            out_specs=pl.BlockSpec((None, 1, 1, Cout), lambda n: (n, 0, 0, 0)),
            compiler_params=pltpu.CompilerParams(
                dimension_semantics=("parallel",),
                vmem_limit_bytes=vmem_limit),
            cost_estimate=pl.CostEstimate(
                flops=4 * M * Cout, transcendentals=0,
                bytes_accessed=4 * (M * Cout + N * Cout + 2 * Cout)),
        )(conv_nhwc, scale, shift)
    else:
        Ht = _pick_h_tile(H)
        Ho, Wo = H // 2, W // 2
        out_nhwc = pl.pallas_call(
            _bn_relu_maxpool_kernel,
            out_shape=jax.ShapeDtypeStruct((N, Ho, Wo, Cout), f32),
            grid=(N, H // Ht),
            in_specs=[pl.BlockSpec((None, Ht, W, Cout), lambda n, h: (n, h, 0, 0)),
                      pl.BlockSpec((1, Cout), lambda n, h: (0, 0)),
                      pl.BlockSpec((1, Cout), lambda n, h: (0, 0))],
            out_specs=pl.BlockSpec((None, Ht // 2, Wo, Cout), lambda n, h: (n, h, 0, 0)),
            scratch_shapes=[pltpu.VMEM((Ht // 2, W, Cout), f32)],
            compiler_params=pltpu.CompilerParams(
                dimension_semantics=("parallel", "parallel"),
                vmem_limit_bytes=vmem_limit),
            cost_estimate=pl.CostEstimate(
                flops=5 * M * Cout, transcendentals=0,
                bytes_accessed=4 * (M * Cout + N * Ho * Wo * Cout + 2 * Cout)),
        )(conv_nhwc, scale, shift)

    return jnp.transpose(out_nhwc, (0, 3, 1, 2))       # back to NCHW


# --------------------------------------------------------------------------------------
# Pure-JAX reference mirroring the PyTorch forward (training-mode BN, bias included).
# --------------------------------------------------------------------------------------
def _reference(x_nchw, conv_w, conv_b, gamma, beta, block_idx, eps=1e-5):
    y = jax.lax.conv_general_dilated(
        x_nchw.astype(jnp.float32), conv_w.astype(jnp.float32),
        window_strides=(1, 1), padding=((1, 1), (1, 1)),
        dimension_numbers=("NCHW", "OIHW", "NCHW"))
    y = y + conv_b[None, :, None, None]
    mean = jnp.mean(y, axis=(0, 2, 3), keepdims=True)
    var = jnp.mean((y - mean) ** 2, axis=(0, 2, 3), keepdims=True)
    y = gamma[None, :, None, None] * (y - mean) * jax.lax.rsqrt(var + eps) \
        + beta[None, :, None, None]
    y = jnp.maximum(y, 0.0)
    if block_idx == 3:
        return jnp.max(y, axis=(2, 3), keepdims=True)
    return jax.lax.reduce_window(y, -jnp.inf, jax.lax.max,
                                 (1, 1, 2, 2), (1, 1, 2, 2), "VALID")


if __name__ == "__main__":
    # Small shapes consistent with the module: batch=2, in_ch=4, out_ch=8, 16x16.
    N, Cin, Cout, H, W = 2, 4, 8, 16, 16

    key = jax.random.PRNGKey(0)
    kx, kw, kb, kg, kbe = jax.random.split(key, 5)
    x = jax.random.normal(kx, (N, Cin, H, W), dtype=jnp.float32)
    conv_w = jax.random.normal(kw, (Cout, Cin, 3, 3), dtype=jnp.float32) * 0.1
    conv_b = jax.random.normal(kb, (Cout,), dtype=jnp.float32) * 0.1
    gamma = 1.0 + 0.1 * jax.random.normal(kg, (Cout,), dtype=jnp.float32)
    beta = 0.1 * jax.random.normal(kbe, (Cout,), dtype=jnp.float32)

    # blocks 0..2 -> MaxPool2d(2)
    out1 = jax.block_until_ready(
        basic_block_forward(x, conv_w, conv_b, gamma, beta, block_idx=1))
    ref1 = jax.block_until_ready(_reference(x, conv_w, conv_b, gamma, beta, 1))
    assert out1.shape == (N, Cout, H // 2, W // 2), out1.shape
    np.testing.assert_allclose(np.asarray(out1), np.asarray(ref1), atol=2e-4, rtol=2e-4)

    # block 3 -> AdaptiveMaxPool2d((1, 1))
    out3 = jax.block_until_ready(
        basic_block_forward(x, conv_w, conv_b, gamma, beta, block_idx=3))
    ref3 = jax.block_until_ready(_reference(x, conv_w, conv_b, gamma, beta, 3))
    assert out3.shape == (N, Cout, 1, 1), out3.shape
    np.testing.assert_allclose(np.asarray(out3), np.asarray(ref3), atol=2e-4, rtol=2e-4)

    print("KERNEL_OK")
</pallas_src>

<mosaic_0001>
module attributes {stable_mosaic.version = 11 : i64} {
  func.func @_conv_stats_kernel(%arg0: i32, %arg1: memref<256x36xf32, #tpu.memory_space<vmem>>, %arg2: memref<36x8xf32, #tpu.memory_space<vmem>>, %arg3: memref<256x8xf32, #tpu.memory_space<vmem>>, %arg4: memref<1x8xf32, #tpu.memory_space<vmem>>, %arg5: memref<1x8xf32, #tpu.memory_space<vmem>>) attributes {dimension_semantics = [#tpu.dimension_semantics<arbitrary>], iteration_bounds = array<i64: 2>, scalar_prefetch = 0 : i64, scratch_operands = 0 : i64, tpu.core_type = #tpu.core_type<tc>, window_params = [{transform_indices = @transform_0, window_bounds = array<i64: 256, 36>}, {pipeline_mode = #tpu.pipeline_mode<synchronous>, transform_indices = @transform_1, window_bounds = array<i64: 36, 8>}, {transform_indices = @transform_2, window_bounds = array<i64: 256, 8>}, {pipeline_mode = #tpu.pipeline_mode<synchronous>, transform_indices = @transform_3, window_bounds = array<i64: 1, 8>}, {pipeline_mode = #tpu.pipeline_mode<synchronous>, transform_indices = @transform_4, window_bounds = array<i64: 1, 8>}]} {
    %c0 = arith.constant 0 : index
    %c0_0 = arith.constant 0 : index
    %0 = vector.load %arg1[%c0, %c0_0] : memref<256x36xf32, #tpu.memory_space<vmem>>, vector<256x36xf32>
    %c0_1 = arith.constant 0 : index
    %c0_2 = arith.constant 0 : index
    %1 = vector.load %arg2[%c0_1, %c0_2] : memref<36x8xf32, #tpu.memory_space<vmem>>, vector<36x8xf32>
    %cst = arith.constant dense<0.000000e+00> : vector<256x8xf32>
    %2 = tpu.matmul %0, %1, %cst {dimension_numbers = #tpu.dot_dimension_numbers<[1], [0], [0], [1], [0, 0, 1, 1], [], []>} : vector<256x36xf32>, vector<36x8xf32>, vector<256x8xf32> -> vector<256x8xf32>
    %c0_3 = arith.constant 0 : index
    %c0_4 = arith.constant 0 : index
    %3 = vector.load %arg3[%c0_3, %c0_4] : memref<256x8xf32, #tpu.memory_space<vmem>>, vector<256x8xf32>
    tpu.vector_store %arg3[%c0_3, %c0_4], %2 {strides = array<i32>} : memref<256x8xf32, #tpu.memory_space<vmem>>, vector<256x8xf32>,
    %c0_i32 = arith.constant 0 : i32
    %4 = arith.cmpi eq, %arg0, %c0_i32 : i32
    %5 = arith.extui %4 : i1 to i32
    %c0_i32_5 = arith.constant 0 : i32
    %6 = arith.cmpi ne, %5, %c0_i32_5 : i32
    scf.if %6 {
      %cst_16 = arith.constant 0.000000e+00 : f32
      %18 = vector.broadcast %cst_16 : f32 to vector<1x8xf32>
      %c0_17 = arith.constant 0 : index
      %c0_18 = arith.constant 0 : index
      %19 = vector.load %arg4[%c0_17, %c0_18] : memref<1x8xf32, #tpu.memory_space<vmem>>, vector<1x8xf32>
      tpu.vector_store %arg4[%c0_17, %c0_18], %18 {strides = array<i32>} : memref<1x8xf32, #tpu.memory_space<vmem>>, vector<1x8xf32>,
      %cst_19 = arith.constant 0.000000e+00 : f32
      %20 = vector.broadcast %cst_19 : f32 to vector<1x8xf32>
      %c0_20 = arith.constant 0 : index
      %c0_21 = arith.constant 0 : index
      %21 = vector.load %arg5[%c0_20, %c0_21] : memref<1x8xf32, #tpu.memory_space<vmem>>, vector<1x8xf32>
      tpu.vector_store %arg5[%c0_20, %c0_21], %20 {strides = array<i32>} : memref<1x8xf32, #tpu.memory_space<vmem>>, vector<1x8xf32>,
    } else {
    }
    %c0_6 = arith.constant 0 : index
    %c0_7 = arith.constant 0 : index
    %7 = vector.load %arg4[%c0_6, %c0_7] : memref<1x8xf32, #tpu.memory_space<vmem>>, vector<1x8xf32>
    %cst_8 = arith.constant dense<0.000000e+00> : vector<8xf32>
    %8 = vector.multi_reduction <add>, %2, %cst_8 [0] : vector<256x8xf32> to vector<8xf32>
    %9 = vector.shape_cast %8 : vector<8xf32> to vector<1x8xf32>
    %10 = arith.addf %7, %9 : vector<1x8xf32>
    %c0_9 = arith.constant 0 : index
    %c0_10 = arith.constant 0 : index
    %11 = vector.load %arg4[%c0_9, %c0_10] : memref<1x8xf32, #tpu.memory_space<vmem>>, vector<1x8xf32>
    tpu.vector_store %arg4[%c0_9, %c0_10], %10 {strides = array<i32>} : memref<1x8xf32, #tpu.memory_space<vmem>>, vector<1x8xf32>,
    %c0_11 = arith.constant 0 : index
    %c0_12 = arith.constant 0 : index
    %12 = vector.load %arg5[%c0_11, %c0_12] : memref<1x8xf32, #tpu.memory_space<vmem>>, vector<1x8xf32>
    %13 = arith.mulf %2, %2 : vector<256x8xf32>
    %cst_13 = arith.constant dense<0.000000e+00> : vector<8xf32>
    %14 = vector.multi_reduction <add>, %13, %cst_13 [0] : vector<256x8xf32> to vector<8xf32>
    %15 = vector.shape_cast %14 : vector<8xf32> to vector<1x8xf32>
    %16 = arith.addf %12, %15 : vector<1x8xf32>
    %c0_14 = arith.constant 0 : index
    %c0_15 = arith.constant 0 : index
    %17 = vector.load %arg5[%c0_14, %c0_15] : memref<1x8xf32, #tpu.memory_space<vmem>>, vector<1x8xf32>
    tpu.vector_store %arg5[%c0_14, %c0_15], %16 {strides = array<i32>} : memref<1x8xf32, #tpu.memory_space<vmem>>, vector<1x8xf32>,
    return
  }
  func.func @transform_0(%arg0: i32) -> (i32, i32) {
    %c0_i32 = arith.constant 0 : i32
    %c0_i32_0 = arith.constant 0 : i32
    return %arg0, %c0_i32 : i32, i32
  }
  func.func @transform_1(%arg0: i32) -> (i32, i32) {
    %c0_i32 = arith.constant 0 : i32
    %c0_i32_0 = arith.constant 0 : i32
    %c0_i32_1 = arith.constant 0 : i32
    return %c0_i32, %c0_i32_0 : i32, i32
  }
  func.func @transform_2(%arg0: i32) -> (i32, i32) {
    %c0_i32 = arith.constant 0 : i32
    %c0_i32_0 = arith.constant 0 : i32
    return %arg0, %c0_i32 : i32, i32
  }
  func.func @transform_3(%arg0: i32) -> (i32, i32) {
    %c0_i32 = arith.constant 0 : i32
    %c0_i32_0 = arith.constant 0 : i32
    %c0_i32_1 = arith.constant 0 : i32
    return %c0_i32, %c0_i32_0 : i32, i32
  }
  func.func @transform_4(%arg0: i32) -> (i32, i32) {
    %c0_i32 = arith.constant 0 : i32
    %c0_i32_0 = arith.constant 0 : i32
    %c0_i32_1 = arith.constant 0 : i32
    return %c0_i32, %c0_i32_0 : i32, i32
  }
}

</mosaic_0001>

<bundles_post_ra>
// kernel: tpu_custom_call.1
= control target key start
LH: loop header
LB: loop body
LE: loop exit
PB: predicated region body
PF: predicated region fallthrough
CT: control target
= control target key end

     0   :  { %10 = vsyncpa [#allocation3], 0  ;;  %s1605_s0 = inlined_call_operand.vmem [shape: f32[512,36], index: 0, kind: input, shape index: {}]   ;;  %s1606_s1 = inlined_call_operand.vmem [shape: f32[36,8], index: 1, kind: input, shape index: {}]   ;;  %s1607_s2 = inlined_call_operand.vmem [shape: f32[512,8], index: 2, kind: output, shape index: {0}]   ;;  %s1608_s3 = inlined_call_operand.hbm [shape: f32[1,8], index: 3, kind: output, shape index: {1}]   ;;  %s1609_s4 = inlined_call_operand.hbm [shape: f32[1,8], index: 4, kind: output, shape index: {2}]  }
   0x1   :  { %11 = vsyncpa [#allocation5], 0  ;;  %s1149_s15 = smov 0  }
   0x2 LB: > { %s1155_s16 = sadd.s32 4294967295, %s1119_s15   ;;  %p884_p0 = scmp.ge.s32.totalorder %s1119_s15, 1  ;;  %s1119_s15 = sphi %s1149_s15, %s17_s15  }
   0x3   : > { %p160_p1 = scmp.lt.s32.totalorder %s1119_s15, 3 }
   0x5   : > { %p161_p2 = pnand %p884_p0, %p160_p1 }
   0x6   : > { %s885_s21 = sshll.u32 (!%p161_p2), %s1155_s16, 5  ;;  %p922_p4 = scmp.ne.s32.totalorder (!%p161_p2), %s1155_s16, 0 }
   0x7   : > { %164 = sbr.rel (%p161_p2) target bundleno = 352 (0x160), region = 28  ;;  %p187_p3 = scmp.lt.s32.totalorder (!%p161_p2), %s885_s21, 63 }
   0xc   : > { %v234_v0 = vld [vmem:[%s1606_s1 + $0x20] sm:$0xf]  ;;  %vm332_vm0 = vcmask 1043456   ;;  %v233_v1 = vld [vmem:[%s1606_s1 + $0x18] sm:$0xff]  ;;  %v232_v2 = vld [vmem:[%s1606_s1 + $0x10] sm:$0xff]  ;;  %s1611_s21 = smov (!%p187_p3, %s885_s21), 63 }
   0xd   : > { %966 = vmatprep.subr.msk.mxu0 %vm332_vm0, %v234_v0  ;;  %1024 = vmatprep.subr.msk.mxu1 %vm332_vm0, %v234_v0  ;;  %v231_v3 = vld [vmem:[%s1606_s1 + $0x8] sm:$0xff]  ;;  %s886_s26 = sshll.u32 %s1611_s21, 3  ;;  %v230_v4 = vld [vmem:[%s1606_s1] sm:$0xff]  ;;  %vm235_vm1 = vcmask 293888   ;;  %vm561_vm2 = vcmask 64512  }
   0xe   : > { %967 = vmatpush3.msk.msra.mxu0 %vm332_vm0, %v234_v0  ;;  %1029 = vmatpush3.msk.msra.mxu1 %vm332_vm0, %v234_v0  ;;  %s1183_s5 = scalar_lea.vmem %s1605_s0, %s886_s26  ;;  %s1254_s8 = scalar_lea.vmem %s1607_s2, %s886_s26 }
   0xf   : > { %968 = vmatprep.subr.mxu0 %v233_v1  ;;  %1025 = vmatprep.subr.mxu1 %v233_v1  ;;  %v198_v5 = vld [vmem:[%s1183_s5] sm:$0xff]  ;;  %v199_v7 = vld [vmem:[%s1183_s5 + $0x8] sm:$0xff]  ;;  %v200_v9 = vld [vmem:[%s1183_s5 + $0x10] sm:$0xff] }
  0x10   : > { %969 = vmatpush3.msra.mxu0 %v233_v1  ;;  %1030 = vmatpush3.msra.mxu1 %v233_v1  ;;  %v214_v6 = vld [vmem:[%s1183_s5 + $0x80] sm:$0xff]  ;;  %v215_v8 = vld [vmem:[%s1183_s5 + $0x88] sm:$0xff]  ;;  %v216_v10 = vld [vmem:[%s1183_s5 + $0x90] sm:$0xff] }
  0x11   : > { %970 = vmatprep.subr.mxu0 %v232_v2  ;;  %1026 = vmatprep.subr.mxu1 %v232_v2  ;;  %v201_v11 = vld [vmem:[%s1183_s5 + $0x18] sm:$0xff]  ;;  %v202_v13 = vld [vmem:[%s1183_s5 + $0x20] sm:$0xff]  ;;  %v203_v15 = vld [vmem:[%s1183_s5 + $0x28] sm:$0xff] }
  0x12   : > { %971 = vmatpush3.msra.mxu0 %v232_v2  ;;  %1031 = vmatpush3.msra.mxu1 %v232_v2  ;;  %v217_v12 = vld [vmem:[%s1183_s5 + $0x98] sm:$0xff]  ;;  %v218_v14 = vld [vmem:[%s1183_s5 + $0xa0] sm:$0xff]  ;;  %v219_v16 = vld [vmem:[%s1183_s5 + $0xa8] sm:$0xff] }
  0x13   : > { %972 = vmatprep.subr.mxu0 %v231_v3  ;;  %1027 = vmatprep.subr.mxu1 %v231_v3  ;;  %v204_v17 = vld [vmem:[%s1183_s5 + $0x30] sm:$0xff]  ;;  %v205_v19 = vld [vmem:[%s1183_s5 + $0x38] sm:$0xff]  ;;  %v206_v21 = vld [vmem:[%s1183_s5 + $0x40] sm:$0xff] }
  0x14   : > { %973 = vmatpush3.msra.mxu0 %v231_v3  ;;  %1032 = vmatpush3.msra.mxu1 %v231_v3  ;;  %v220_v18 = vld [vmem:[%s1183_s5 + $0xb0] sm:$0xff]  ;;  %v221_v20 = vld [vmem:[%s1183_s5 + $0xb8] sm:$0xff]  ;;  %v222_v22 = vld [vmem:[%s1183_s5 + $0xc0] sm:$0xff] }
  0x15   : > { %974 = vmatprep.subr.mxu0 %v230_v4  ;;  %1028 = vmatprep.subr.mxu1 %v230_v4  ;;  %v207_v23 = vld [vmem:[%s1183_s5 + $0x48] sm:$0xff]  ;;  %v208_v25 = vld [vmem:[%s1183_s5 + $0x50] sm:$0xff]  ;;  %v209_v27 = vld [vmem:[%s1183_s5 + $0x58] sm:$0xff] }
  0x16   : > { %975 = vmatpush3.msra.mxu0 %v230_v4  ;;  %1033 = vmatpush3.msra.mxu1 %v230_v4  ;;  %v223_v24 = vld [vmem:[%s1183_s5 + $0xc8] sm:$0xff]  ;;  %v224_v26 = vld [vmem:[%s1183_s5 + $0xd0] sm:$0xff]  ;;  %v225_v28 = vld [vmem:[%s1183_s5 + $0xd8] sm:$0xff] }
  0x17   : > { %976 = vmatprep.mubr.msk.f32.mxu0 %vm235_vm1, %v198_v5  ;;  %1000 = vmatprep.mubr.msk.f32.mxu1 %vm235_vm1, %v214_v6  ;;  %v210_v29 = vld [vmem:[%s1183_s5 + $0x60] sm:$0xff]  ;;  %v211_v31 = vld [vmem:[%s1183_s5 + $0x68] sm:$0xff]  ;;  %v212_v33 = vld [vmem:[%s1183_s5 + $0x70] sm:$0xff] }
  0x18   : > { %977 = vmatmul.mubr.msk.f32.vlgmr.msra.gmra.mxu0 %vm235_vm1, %v199_v7  ;;  %1001 = vmatmul.mubr.msk.f32.vlgmr.msra.gmra.mxu1 %vm235_vm1, %v215_v8  ;;  %v226_v30 = vld [vmem:[%s1183_s5 + $0xe0] sm:$0xff]  ;;  %v227_v32 = vld [vmem:[%s1183_s5 + $0xe8] sm:$0xff]  ;;  %v228_v34 = vld [vmem:[%s1183_s5 + $0xf0] sm:$0xff] }
  0x19   : > { %979 = vmatprep.mubr.msk.f32.mxu0 %vm235_vm1, %v200_v9  ;;  %1003 = vmatprep.mubr.msk.f32.mxu1 %vm235_vm1, %v216_v10  ;;  %v213_v35 = vld [vmem:[%s1183_s5 + $0x78] sm:$0xff] }
  0x1a   : > { %v229_v36 = vld [vmem:[%s1183_s5 + $0xf8] sm:$0xff] }
  0x1c   : > { %980 = vmatmul.mubr.msk.f32.gmra.mxu0 %vm235_vm1, %v201_v11  ;;  %1004 = vmatmul.mubr.msk.f32.gmra.mxu1 %vm235_vm1, %v217_v12 }
  0x1d   : > { %982 = vmatprep.mubr.msk.f32.mxu0 %vm235_vm1, %v202_v13  ;;  %1006 = vmatprep.mubr.msk.f32.mxu1 %vm235_vm1, %v218_v14 }
  0x20   : > { %983 = vmatmul.mubr.msk.f32.gmra.mxu0 %vm235_vm1, %v203_v15  ;;  %1007 = vmatmul.mubr.msk.f32.gmra.mxu1 %vm235_vm1, %v219_v16 }
  0x21   : > { %985 = vmatprep.mubr.msk.f32.mxu0 %vm235_vm1, %v204_v17  ;;  %1009 = vmatprep.mubr.msk.f32.mxu1 %vm235_vm1, %v220_v18 }
  0x24   : > { %986 = vmatmul.mubr.msk.f32.gmra.mxu0 %vm235_vm1, %v205_v19  ;;  %1010 = vmatmul.mubr.msk.f32.gmra.mxu1 %vm235_vm1, %v221_v20 }
  0x25   : > { %988 = vmatprep.mubr.msk.f32.mxu0 %vm235_vm1, %v206_v21  ;;  %1012 = vmatprep.mubr.msk.f32.mxu1 %vm235_vm1, %v222_v22 }
  0x28   : > { %989 = vmatmul.mubr.msk.f32.gmra.mxu0 %vm235_vm1, %v207_v23  ;;  %1013 = vmatmul.mubr.msk.f32.gmra.mxu1 %vm235_vm1, %v223_v24 }
  0x29   : > { %991 = vmatprep.mubr.msk.f32.mxu0 %vm235_vm1, %v208_v25  ;;  %1015 = vmatprep.mubr.msk.f32.mxu1 %vm235_vm1, %v224_v26 }
  0x2c   : > { %992 = vmatmul.mubr.msk.f32.gmra.mxu0 %vm235_vm1, %v209_v27  ;;  %1016 = vmatmul.mubr.msk.f32.gmra.mxu1 %vm235_vm1, %v225_v28 }
  0x2d   : > { %994 = vmatprep.mubr.msk.f32.mxu0 %vm235_vm1, %v210_v29  ;;  %1018 = vmatprep.mubr.msk.f32.mxu1 %vm235_vm1, %v226_v30 }
  0x30   : > { %995 = vmatmul.mubr.msk.f32.gmra.mxu0 %vm235_vm1, %v211_v31  ;;  %1019 = vmatmul.mubr.msk.f32.gmra.mxu1 %vm235_vm1, %v227_v32 }
  0x31   : > { %997 = vmatprep.mubr.msk.f32.mxu0 %vm235_vm1, %v212_v33  ;;  %1021 = vmatprep.mubr.msk.f32.mxu1 %vm235_vm1, %v228_v34 }
  0x34   : > { %998 = vmatmul.mubr.msk.f32.gmra.mxu0 %vm235_vm1, %v213_v35  ;;  %1022 = vmatmul.mubr.msk.f32.gmra.mxu1 %vm235_vm1, %v229_v36 }
  0xd8   : > { %v1256_v37 = vpop.f32.mrf.mxu0  ;;  %v1258_v38 = vpop.f32.mrf.mxu1 }
  0xd9   : > { %563 = vst.msk [vmem:[%s1254_s8 + $0x8] sm:$0xff] %vm561_vm2, %v1256_v37  ;;  %579 = vst.msk [vmem:[%s1254_s8 + $0x88] sm:$0xff] %vm561_vm2, %v1258_v38 }
  0xda   : > { %v1266_v39 = vpop.f32.mrf.mxu0  ;;  %v1268_v40 = vpop.f32.mrf.mxu1 }
  0xdb   : > { %562 = vst.msk [vmem:[%s1254_s8] sm:$0xff] %vm561_vm2, %v1266_v39  ;;  %578 = vst.msk [vmem:[%s1254_s8 + $0x80] sm:$0xff] %vm561_vm2, %v1268_v40 }
  0xdc   : > { %v1276_v41 = vpop.f32.mrf.mxu0  ;;  %v1278_v42 = vpop.f32.mrf.mxu1 }
  0xdd   : > { %565 = vst.msk [vmem:[%s1254_s8 + $0x18] sm:$0xff] %vm561_vm2, %v1276_v41  ;;  %581 = vst.msk [vmem:[%s1254_s8 + $0x98] sm:$0xff] %vm561_vm2, %v1278_v42 }
  0xde   : > { %v1286_v43 = vpop.f32.mrf.mxu0  ;;  %v1288_v44 = vpop.f32.mrf.mxu1 }
  0xdf   : > { %564 = vst.msk [vmem:[%s1254_s8 + $0x10] sm:$0xff] %vm561_vm2, %v1286_v43  ;;  %580 = vst.msk [vmem:[%s1254_s8 + $0x90] sm:$0xff] %vm561_vm2, %v1288_v44 }
  0xe0   : > { %v1296_v45 = vpop.f32.mrf.mxu0  ;;  %v1298_v46 = vpop.f32.mrf.mxu1 }
  0xe1   : > { %567 = vst.msk [vmem:[%s1254_s8 + $0x28] sm:$0xff] %vm561_vm2, %v1296_v45  ;;  %583 = vst.msk [vmem:[%s1254_s8 + $0xa8] sm:$0xff] %vm561_vm2, %v1298_v46 }
  0xe2   : > { %v1306_v47 = vpop.f32.mrf.mxu0  ;;  %v1308_v48 = vpop.f32.mrf.mxu1 }
  0xe3   : > { %566 = vst.msk [vmem:[%s1254_s8 + $0x20] sm:$0xff] %vm561_vm2, %v1306_v47  ;;  %582 = vst.msk [vmem:[%s1254_s8 + $0xa0] sm:$0xff] %vm561_vm2, %v1308_v48 }
  0xe4   : > { %v1316_v49 = vpop.f32.mrf.mxu0  ;;  %v1318_v50 = vpop.f32.mrf.mxu1 }
  0xe5   : > { %569 = vst.msk [vmem:[%s1254_s8 + $0x38] sm:$0xff] %vm561_vm2, %v1316_v49  ;;  %585 = vst.msk [vmem:[%s1254_s8 + $0xb8] sm:$0xff] %vm561_vm2, %v1318_v50 }
  0xe6   : > { %v1326_v51 = vpop.f32.mrf.mxu0  ;;  %v1328_v52 = vpop.f32.mrf.mxu1 }
  0xe7   : > { %568 = vst.msk [vmem:[%s1254_s8 + $0x30] sm:$0xff] %vm561_vm2, %v1326_v51  ;;  %584 = vst.msk [vmem:[%s1254_s8 + $0xb0] sm:$0xff] %vm561_vm2, %v1328_v52 }
  0xe8   : > { %v1336_v53 = vpop.f32.mrf.mxu0  ;;  %v1338_v54 = vpop.f32.mrf.mxu1 }
  0xe9   : > { %571 = vst.msk [vmem:[%s1254_s8 + $0x48] sm:$0xff] %vm561_vm2, %v1336_v53  ;;  %587 = vst.msk [vmem:[%s1254_s8 + $0xc8] sm:$0xff] %vm561_vm2, %v1338_v54 }
  0xea   : > { %v1346_v55 = vpop.f32.mrf.mxu0  ;;  %v1348_v56 = vpop.f32.mrf.mxu1 }
  0xeb   : > { %570 = vst.msk [vmem:[%s1254_s8 + $0x40] sm:$0xff] %vm561_vm2, %v1346_v55  ;;  %586 = vst.msk [vmem:[%s1254_s8 + $0xc0] sm:$0xff] %vm561_vm2, %v1348_v56 }
  0xec   : > { %v1356_v57 = vpop.f32.mrf.mxu0  ;;  %v1358_v58 = vpop.f32.mrf.mxu1 }
  0xed   : > { %573 = vst.msk [vmem:[%s1254_s8 + $0x58] sm:$0xff] %vm561_vm2, %v1356_v57  ;;  %589 = vst.msk [vmem:[%s1254_s8 + $0xd8] sm:$0xff] %vm561_vm2, %v1358_v58 }
  0xee   : > { %v1366_v59 = vpop.f32.mrf.mxu0  ;;  %v1368_v60 = vpop.f32.mrf.mxu1 }
  0xef   : > { %572 = vst.msk [vmem:[%s1254_s8 + $0x50] sm:$0xff] %vm561_vm2, %v1366_v59  ;;  %588 = vst.msk [vmem:[%s1254_s8 + $0xd0] sm:$0xff] %vm561_vm2, %v1368_v60 }
  0xf0   : > { %v1376_v61 = vpop.f32.mrf.mxu0  ;;  %v1378_v62 = vpop.f32.mrf.mxu1 }
  0xf1   : > { %575 = vst.msk [vmem:[%s1254_s8 + $0x68] sm:$0xff] %vm561_vm2, %v1376_v61  ;;  %591 = vst.msk [vmem:[%s1254_s8 + $0xe8] sm:$0xff] %vm561_vm2, %v1378_v62 }
  0xf2   : > { %v1386_v63 = vpop.f32.mrf.mxu0  ;;  %v1388_v0 = vpop.f32.mrf.mxu1 }
  0xf3   : > { %574 = vst.msk [vmem:[%s1254_s8 + $0x60] sm:$0xff] %vm561_vm2, %v1386_v63  ;;  %590 = vst.msk [vmem:[%s1254_s8 + $0xe0] sm:$0xff] %vm561_vm2, %v1388_v0  ;;  %597 = sbr.rel (%p922_p4) target bundleno = 250 (0xfa), region = 32 }
  0xf4   : > { %v1396_v1 = vpop.f32.mrf.mxu0  ;;  %v1398_v2 = vpop.f32.mrf.mxu1 }
  0xf5   : > { %577 = vst.msk [vmem:[%s1254_s8 + $0x78] sm:$0xff] %vm561_vm2, %v1396_v1  ;;  %593 = vst.msk [vmem:[%s1254_s8 + $0xf8] sm:$0xff] %vm561_vm2, %v1398_v2 }
  0xf6   : > { %v1406_v3 = vpop.f32.mrf.mxu0  ;;  %v1408_v4 = vpop.f32.mrf.mxu1 }
  0xf7   : > { %576 = vst.msk [vmem:[%s1254_s8 + $0x70] sm:$0xff] %vm561_vm2, %v1406_v3  ;;  %592 = vst.msk [vmem:[%s1254_s8 + $0xf0] sm:$0xff] %vm561_vm2, %v1408_v4 }
  0xf8   : > { %vm598_vm3 = vcmask 57344   ;;  %v1121_v5 = vmov 0.0  }
  0xf9   : > { %599 = vst.msk [vmem:[#allocation2] sm:$0x1] %vm598_vm3, %v1121_v5  ;;  %600 = vst.msk [vmem:[#allocation4] sm:$0x1] %vm598_vm3, %v1121_v5 }
  0xfa PF: > { %v602_v6 = vsel %vm561_vm2, %v1266_v39, 0.0  ;;  %v603_v7 = vsel %vm561_vm2, %v1256_v37, 0.0  ;;  %v605_v8 = vsel %vm561_vm2, %v1286_v43, 0.0  ;;  %v607_v10 = vsel %vm561_vm2, %v1276_v41, 0.0  ;;  %s1122_s9 = smov [#allocation2]   ;;  %p1042_p5 = scmp.eq.s32.totalorder %s1155_s16, 1 }
  0xfb   : > { %v604_v9 = vadd.f32 %v603_v7, %v602_v6  ;;  %v609_v12 = vsel %vm561_vm2, %v1306_v47, 0.0  ;;  %v611_v14 = vsel %vm561_vm2, %v1296_v45, 0.0  ;;  %v613_v16 = vsel %vm561_vm2, %v1326_v51, 0.0  ;;  %s794_s10 = sshll.u32 %s1122_s9, 4  ;;  %s795_s10 = int_to_ptr.vmem [resolvable:$true] %s794_s10 }
  0xfc   : > { %v615_v18 = vsel %vm561_vm2, %v1316_v49, 0.0  ;;  %v617_v20 = vsel %vm561_vm2, %v1346_v55, 0.0  ;;  %v619_v22 = vsel %vm561_vm2, %v1336_v53, 0.0  ;;  %v675_v23 = vmul.f32 %v1266_v39, %v1266_v39  ;;  %s1057_s11 = scalar_lea.vmem %s795_s10, 16  ;;  %s1063_s12 = scalar_lea.vmem %s795_s10, 32 }
  0xfd   : > { %v606_v11 = vadd.f32 %v605_v8, %v604_v9  ;;  %v676_v24 = vmul.f32 %v1256_v37, %v1256_v37  ;;  %v677_v26 = vmul.f32 %v1286_v43, %v1286_v43  ;;  %v621_v27 = vsel %vm561_vm2, %v1366_v59, 0.0  ;;  %p1058_p6 = scmp.ne.s32.totalorder %s795_s10, %s1057_s11  ;;  %p1064_p9 = scmp.lt.s32.totalorder %s795_s10, %s795_s10 }
  0xfe   : > { %v678_v28 = vmul.f32 %v1276_v41, %v1276_v41  ;;  %v623_v30 = vsel %vm561_vm2, %v1356_v57, 0.0  ;;  %v679_v31 = vmul.f32 %v1306_v47, %v1306_v47  ;;  %v707_v32 = vsel %vm561_vm2, %v675_v23, 0.0  ;;  %p1065_p10 = scmp.lt.s32.totalorder %s1063_s12, %s1057_s11 }
  0xff   : > { %v608_v13 = vadd.f32 %v607_v10, %v606_v11  ;;  %v708_v33 = vsel %vm561_vm2, %v676_v24, 0.0  ;;  %v710_v36 = vsel %vm561_vm2, %v677_v26, 0.0  ;;  %v625_v37 = vsel %vm561_vm2, %v1386_v63, 0.0  ;;  %p1059_p7 = pnand %p1058_p6, %p1042_p5 }
 0x100   : > { %v709_v35 = vadd.f32 %v708_v33, %v707_v32  ;;  %v680_v39 = vmul.f32 %v1296_v45, %v1296_v45  ;;  %v712_v41 = vsel %vm561_vm2, %v678_v28, 0.0  ;;  %v627_v47 = vsel %vm561_vm2, %v1376_v61, 0.0  ;;  %p1066_p11 = por %p1065_p10, %p1064_p9 }
 0x101   : > { %v610_v15 = vadd.f32 %v609_v12, %v608_v13  ;;  %v681_v6 = vmul.f32 %v1326_v51, %v1326_v51  ;;  %v714_v7 = vsel %vm561_vm2, %v679_v31, 0.0  ;;  %v629_v10 = vsel %vm561_vm2, %v1406_v3, 0.0  ;;  %p1060_p8 = pneg %p1059_p7 }
 0x102   : > { %v711_v5 = vadd.f32 %v710_v36, %v709_v35  ;;  %v682_v45 = vmul.f32 %v1316_v49, %v1316_v49  ;;  %v716_v11 = vsel %vm561_vm2, %v680_v39, 0.0  ;;  %v683_v51 = vmul.f32 %v1346_v55, %v1346_v55 }
 0x103   : > { %v612_v17 = vadd.f32 %v611_v14, %v610_v15  ;;  %v631_v14 = vsel %vm561_vm2, %v1396_v1, 0.0  ;;  %v718_v15 = vsel %vm561_vm2, %v681_v6, 0.0  ;;  %v684_v49 = vmul.f32 %v1336_v53, %v1336_v53  ;;  %p1067_p12 = pnand %p1066_p11, %p1060_p8 }
 0x104   : > { %v713_v9 = vadd.f32 %v712_v41, %v711_v5  ;;  %v685_v55 = vmul.f32 %v1366_v59, %v1366_v59  ;;  %v722_v23 = vsel %vm561_vm2, %v683_v51, 0.0  ;;  %v637_v26 = vsel %vm561_vm2, %v1288_v44, 0.0 }
 0x105   : > { %v614_v19 = vadd.f32 %v613_v16, %v612_v17  ;;  %v686_v53 = vmul.f32 %v1356_v57, %v1356_v57  ;;  %v687_v59 = vmul.f32 %v1386_v63, %v1386_v63  ;;  %v688_v57 = vmul.f32 %v1376_v61, %v1376_v61 }
 0x106   : > { %v715_v13 = vadd.f32 %v714_v7, %v713_v9  ;;  %v726_v31 = vsel %vm561_vm2, %v685_v55, 0.0  ;;  %v643_v39 = vsel %vm561_vm2, %v1298_v46, 0.0  ;;  %v689_v63 = vmul.f32 %v1406_v3, %v1406_v3 }
 0x107   : > { %v616_v21 = vadd.f32 %v615_v18, %v614_v19  ;;  %v633_v18 = vsel %vm561_vm2, %v1268_v40, 0.0  ;;  %v720_v19 = vsel %vm561_vm2, %v682_v45, 0.0  ;;  %v728_v35 = vsel %vm561_vm2, %v686_v53, 0.0 }
 0x108   : > { %v717_v17 = vadd.f32 %v716_v11, %v715_v13  ;;  %v730_v41 = vsel %vm561_vm2, %v687_v59, 0.0  ;;  %v690_v61 = vmul.f32 %v1396_v1, %v1396_v1  ;;  %v732_v6 = vsel %vm561_vm2, %v688_v57, 0.0 }
 0x109   : > { %v618_v25 = vadd.f32 %v617_v20, %v616_v21  ;;  %v647_v9 = vsel %vm561_vm2, %v1318_v50, 0.0  ;;  %v691_v3 = vmul.f32 %v1268_v40, %v1268_v40  ;;  %v692_v1 = vmul.f32 %v1258_v38, %v1258_v38 }
 0x10a   : > { %v719_v21 = vadd.f32 %v718_v15, %v717_v17  ;;  %v736_v13 = vsel %vm561_vm2, %v690_v61, 0.0  ;;  %v651_v15 = vsel %vm561_vm2, %v1338_v54, 0.0  ;;  %v693_v40 = vmul.f32 %v1288_v44, %v1288_v44 }
 0x10b   : > { %v620_v29 = vadd.f32 %v619_v22, %v618_v25  ;;  %v635_v22 = vsel %vm561_vm2, %v1258_v38, 0.0  ;;  %v694_v38 = vmul.f32 %v1278_v42, %v1278_v42  ;;  %v695_v44 = vmul.f32 %v1308_v48, %v1308_v48 }
 0x10c   : > { %v721_v25 = vadd.f32 %v720_v19, %v719_v21  ;;  %v740_v19 = vsel %vm561_vm2, %v692_v1, 0.0  ;;  %v742_v55 = vsel %vm561_vm2, %v693_v40, 0.0  ;;  %v663_v57 = vsel %vm561_vm2, %v1398_v2, 0.0 }
 0x10d   : > { %v622_v34 = vadd.f32 %v621_v27, %v620_v29  ;;  %v724_v27 = vsel %vm561_vm2, %v684_v49, 0.0  ;;  %v653_v49 = vsel %vm561_vm2, %v1368_v60, 0.0  ;;  %vm672_vm4 = vcmask 57344  }
 0x10e   : > { %v723_v29 = vadd.f32 %v722_v23, %v721_v25  ;;  %v657_v25 = vsel %vm561_vm2, %v1388_v0, 0.0 }
 0x10f   : > { %v624_v43 = vadd.f32 %v623_v30, %v622_v34  ;;  %v639_v30 = vsel %vm561_vm2, %v1278_v42, 0.0  ;;  %v641_v34 = vsel %vm561_vm2, %v1308_v48, 0.0  ;;  %v696_v42 = vmul.f32 %v1298_v46, %v1298_v46 }
 0x110   : > { %v725_v33 = vadd.f32 %v724_v27, %v723_v29  ;;  %v697_v48 = vmul.f32 %v1328_v52, %v1328_v52  ;;  %v746_v29 = vsel %vm561_vm2, %v695_v44, 0.0  ;;  %v698_v46 = vmul.f32 %v1318_v50, %v1318_v50 }
 0x111   : > { %v626_v8 = vadd.f32 %v625_v37, %v624_v43 }
 0x112   : > { %v727_v37 = vadd.f32 %v726_v31, %v725_v33  ;;  %v661_v31 = vsel %vm561_vm2, %v1408_v4, 0.0 }
 0x113   : > { %v628_v12 = vadd.f32 %v627_v47, %v626_v8  ;;  %v645_v47 = vsel %vm561_vm2, %v1328_v52, 0.0  ;;  %v699_v52 = vmul.f32 %v1348_v56, %v1348_v56 }
 0x114   : > { %v729_v5 = vadd.f32 %v728_v35, %v727_v37  ;;  %v750_v35 = vsel %vm561_vm2, %v697_v48, 0.0 }
 0x115   : > { %v630_v16 = vadd.f32 %v629_v10, %v628_v12  ;;  %v734_v10 = vsel %vm561_vm2, %v689_v63, 0.0  ;;  %v649_v12 = vsel %vm561_vm2, %v1348_v56, 0.0  ;;  %v752_v63 = vsel %vm561_vm2, %v698_v46, 0.0 }
 0x116   : > { %v731_v8 = vadd.f32 %v730_v41, %v729_v5  ;;  %v754_v5 = vsel %vm561_vm2, %v699_v52, 0.0  ;;  %v702_v56 = vmul.f32 %v1358_v58, %v1358_v58 }
 0x117   : > { %v632_v20 = vadd.f32 %v631_v14, %v630_v16  ;;  %v738_v16 = vsel %vm561_vm2, %v691_v3, 0.0 }
 0x118   : > { %v733_v11 = vadd.f32 %v732_v6, %v731_v8 }
 0x119   : > { %v634_v24 = vadd.f32 %v633_v18, %v632_v20 }
 0x11a   : > { %v735_v51 = vadd.f32 %v734_v10, %v733_v11 }
 0x11b   : > { %v636_v28 = vadd.f32 %v635_v22, %v634_v24  ;;  %v655_v22 = vsel %vm561_vm2, %v1358_v58, 0.0  ;;  %v705_v58 = vmul.f32 %v1408_v4, %v1408_v4 }
 0x11c   : > { %v737_v18 = vadd.f32 %v736_v13, %v735_v51  ;;  %v706_v51 = vmul.f32 %v1398_v2, %v1398_v2 }
 0x11d   : > { %v638_v32 = vadd.f32 %v637_v26, %v636_v28  ;;  %v744_v26 = vsel %vm561_vm2, %v694_v38, 0.0  ;;  %v659_v28 = vsel %vm561_vm2, %v1378_v62, 0.0 }
 0x11e   : > { %v739_v21 = vadd.f32 %v738_v16, %v737_v18  ;;  %v766_v16 = vsel %vm561_vm2, %v705_v58, 0.0  ;;  %v768_v18 = vsel %vm561_vm2, %v706_v51, 0.0 }
 0x11f   : > { %v640_v36 = vadd.f32 %v639_v30, %v638_v32  ;;  %v748_v32 = vsel %vm561_vm2, %v696_v42, 0.0 }
 0x120   : > { %v741_v24 = vadd.f32 %v740_v19, %v739_v21 }
 0x121   : > { %v642_v43 = vadd.f32 %v641_v34, %v640_v36 }
 0x122   : > { %v743_v27 = vadd.f32 %v742_v55, %v741_v24 }
 0x123   : > { %v644_v7 = vadd.f32 %v643_v39, %v642_v43  ;;  %v700_v39 = vmul.f32 %v1338_v54, %v1338_v54  ;;  %v701_v43 = vmul.f32 %v1368_v60, %v1368_v60  ;;  %v703_v54 = vmul.f32 %v1388_v0, %v1388_v0  ;;  %v601_v0 = vld [vmem:[#allocation2] sm:$0x1] }
 0x124   : > { %v745_v59 = vadd.f32 %v744_v26, %v743_v27  ;;  %v704_v60 = vmul.f32 %v1378_v62, %v1378_v62 }
 0x125   : > { %v646_v45 = vadd.f32 %v645_v47, %v644_v7  ;;  %v756_v6 = vsel %vm561_vm2, %v700_v39, 0.0  ;;  %v762_v1 = vsel %vm561_vm2, %v703_v54, 0.0 }
 0x126   : > { %v747_v34 = vadd.f32 %v746_v29, %v745_v59 }
 0x127   : > { %v648_v14 = vadd.f32 %v647_v9, %v646_v45  ;;  %v758_v9 = vsel %vm561_vm2, %v701_v43, 0.0  ;;  %v760_v45 = vsel %vm561_vm2, %v702_v56, 0.0 }
 0x128   : > { %v749_v37 = vadd.f32 %v748_v32, %v747_v34 }
 0x129   : > { %v650_v17 = vadd.f32 %v649_v12, %v648_v14 }
 0x12a   : > { %v751_v41 = vadd.f32 %v750_v35, %v749_v37 }
 0x12b   : > { %v652_v20 = vadd.f32 %v651_v15, %v650_v17  ;;  %v764_v15 = vsel %vm561_vm2, %v704_v60, 0.0 }
 0x12c   : > { %v753_v61 = vadd.f32 %v752_v63, %v751_v41 }
 0x12d   : > { %v654_v23 = vadd.f32 %v653_v49, %v652_v20 }
 0x12e   : > { %v755_v8 = vadd.f32 %v754_v5, %v753_v61 }
 0x12f   : > { %v656_v53 = vadd.f32 %v655_v22, %v654_v23 }
 0x130   : > { %v757_v10 = vadd.f32 %v756_v6, %v755_v8 }
 0x131   : > { %v658_v30 = vadd.f32 %v657_v25, %v656_v53 }
 0x132   : > { %v759_v12 = vadd.f32 %v758_v9, %v757_v10 }
 0x133   : > { %v660_v33 = vadd.f32 %v659_v28, %v658_v30 }
 0x134   : > { %v761_v14 = vadd.f32 %v760_v45, %v759_v12 }
 0x135   : > { %v662_v36 = vadd.f32 %v661_v31, %v660_v33 }
 0x136   : > { %v763_v40 = vadd.f32 %v762_v1, %v761_v14 }
 0x137   : > { %v664_v50 = vadd.f32 %v663_v57, %v662_v36 }
 0x138   : > { %v765_v17 = vadd.f32 %v764_v15, %v763_v40 }
 0x139   : > { %v665_v47 = vrot.slane %v664_v50, 4 }
 0x13a   : > { %v767_v49 = vadd.f32 %v766_v16, %v765_v17 }
 0x13b   : > { %v666_v7 = vadd.f32 %v665_v47, %v664_v50 }
 0x13d   : > { %v667_v3 = vrot.slane %v666_v7, 2 }
 0x13f   : > { %v668_v11 = vadd.f32 %v667_v3, %v666_v7 }
 0x141   : > { %v669_v13 = vrot.slane %v668_v11, 1 }
 0x143   : > { %v670_v62 = vadd.f32 %v669_v13, %v668_v11 }
 0x145   : > { %v671_v4 = vadd.f32 %v670_v62, %v601_v0 }
 0x147   : > { %673 = vst.msk [vmem:[#allocation2] sm:$0x1] %vm672_vm4, %v671_v4 }
 0x148   : > { %1070 = shalt.err (!%p1067_p12)
}
 0x149   : > { %1035 = dma.vmem_to_hbm [thread:$0]  (%p1042_p5), %s795_s10, 16, %s1608_s3, [#allocation3]   ;;  %v769_v2 = vadd.f32 %v768_v18, %v767_v49  ;;  %v674_v44 = vld [vmem:[#allocation4] sm:$0x1] }
 0x14a   : > { %s1123_s17 = smov [#allocation4]  }
 0x14b   : > { %v770_v38 = vrot.slane %v769_v2, 4  ;;  %s805_s18 = sshll.u32 %s1123_s17, 4  ;;  %s806_s18 = int_to_ptr.vmem [resolvable:$true] %s805_s18 }
 0x14c   : > { %s1081_s19 = scalar_lea.vmem %s806_s18, 16  ;;  %s1087_s20 = scalar_lea.vmem %s806_s18, 32 }
 0x14d   : > { %v771_v19 = vadd.f32 %v770_v38, %v769_v2  ;;  %p1082_p13 = scmp.ne.s32.totalorder %s806_s18, %s1081_s19  ;;  %p1088_p2 = scmp.lt.s32.totalorder %s806_s18, %s806_s18 }
 0x14e   : > { %p1089_p3 = scmp.lt.s32.totalorder %s1087_s20, %s1081_s19 }
 0x14f   : > { %v772_v20 = vrot.slane %v771_v19, 2  ;;  %p1083_p0 = pnand %p1082_p13, %p1042_p5 }
 0x150   : > { %p1090_p4 = por %p1089_p3, %p1088_p2 }
 0x151   : > { %v773_v21 = vadd.f32 %v772_v20, %v771_v19  ;;  %p1084_p1 = pneg %p1083_p0 }
 0x153   : > { %v774_v22 = vrot.slane %v773_v21, 1  ;;  %p1091_p6 = pnand %p1090_p4, %p1084_p1 }
 0x155   : > { %v775_v55 = vadd.f32 %v774_v22, %v773_v21 }
 0x157   : > { %v776_v23 = vadd.f32 %v775_v55, %v674_v44 }
 0x159   : > { %777 = vst.msk [vmem:[#allocation4] sm:$0x1] %vm672_vm4, %v776_v23 }
 0x15a   : > { %1094 = shalt.err (!%p1091_p6)
}
 0x15b   : > { %1037 = dma.vmem_to_hbm [thread:$0]  (%p1042_p5), %s806_s18, 16, %s1609_s4, [#allocation5]  }
 0x15c   : > { %1110 = dma.done.wait (%p1042_p5), [#allocation3], 16  }
 0x15d   : > { %1112 = vsyncadd (%p1042_p5), [#allocation3], 4294967280 }
 0x15e   : > { %1114 = dma.done.wait (%p1042_p5), [#allocation5], 16  }
 0x15f   : > { %1116 = vsyncadd (%p1042_p5), [#allocation5], 4294967280 }
 0x160 PF: > { %s17_s15 = sadd.s32 1, %s1119_s15  }
 0x161   : > { %p14_p7 = scmp.ge.s32.totalorder %s17_s15, 4  }
 0x163   :  { %16 = sbr.rel (!%p14_p7) target bundleno = 2 (0x2), region = 79 }
 0x168   :  { %830 = vsyncpa [#allocation3], 1 }
 0x169   :  { %832 = vsyncpa [#allocation3 + $0x1], 1 }
 0x16a   :  { %833 = vsyncpa [#allocation5], 1 }

</bundles_post_ra>
